<compile_context>
chip_gen: v7x
topology: tpu7x:2x2x1
jax: 0.10.0
libtpu: 0.0.40
codegen_flags: <defaults>
</compile_context>

<pallas_src>
import jax
import jax.numpy as jnp
from jax.experimental import pallas as pl
from jax.experimental.pallas import tpu as pltpu

_LANE = 128


def _discriminator_kernel(x_ref, p_ref, s_ref, o_ref):
    # x_ref: (1, TB) batch-on-lanes. p_ref: (16, 16) packed params (VMEM).
    # s_ref: (2,) SMEM scalars [alpha1, alpha2]. o_ref: (1, TB).
    x = x_ref[...]                                  # (1, TB) f32
    a1 = s_ref[0]
    a2 = s_ref[1]

    w2_aug = p_ref[0:11, 0:11]                      # (11, 11) [W2|b2 ; 0..0 1]
    w1_col = p_ref[0:11, 11:12]                     # (11, 1)  [w1; 0]
    b1_col = p_ref[0:11, 12:13]                     # (11, 1)  [b1; 1]
    w3_row = p_ref[12:13, 0:11]                     # (1, 11)  [w3 | b3]

    # ---- layer 1: Linear(1 -> 10). K=1 -> pure VPU fused mul-add.
    # Row 10 of the result is 0*x + 1 == 1.0 (the bias-folding ones row).
    h1 = w1_col * x + b1_col                        # (11, TB)
    h1 = jnp.where(h1 >= 0.0, h1, a1 * h1)          # PReLU; keeps ones row == 1

    # ---- layer 2: Linear(10 -> 10) with bias folded -> single MXU matmul.
    h2 = jnp.dot(w2_aug, h1, preferred_element_type=jnp.float32)   # (11, TB)
    h2 = jnp.where(h2 >= 0.0, h2, a2 * h2)          # PReLU; row 10 stays == 1

    # ---- layer 3: Linear(10 -> 1) with bias folded -> MXU, off the VPU/XLU.
    h3 = jnp.dot(w3_row, h2, preferred_element_type=jnp.float32)   # (1, TB)
    o_ref[...] = jax.nn.sigmoid(h3)


def _pack_params(p):
    """Pack the 7 tiny parameter tensors into one VMEM slab + SMEM scalars."""
    slab = jnp.zeros((16, 16), jnp.float32)
    # Bias-folded layer-2 LHS: [W2 | b2] plus a [0..0, 1] row that carries the
    # constant-1 activation row through to layer 3.
    slab = slab.at[0:10, 0:10].set(p["w2"])         # (10, 10) torch (out, in)
    slab = slab.at[0:10, 10].set(p["b2"])
    slab = slab.at[10, 10].set(1.0)
    # Layer-1 column pair: h1_aug = w1_col * x + b1_col (row 10 -> 1.0).
    slab = slab.at[0:10, 11].set(p["w1"][:, 0])
    slab = slab.at[0:10, 12].set(p["b1"])
    slab = slab.at[10, 12].set(1.0)
    # Bias-folded layer-3 LHS row: [w3 | b3].
    slab = slab.at[12, 0:10].set(p["w3"][0, :])
    slab = slab.at[12, 10].set(p["b3"][0])
    scalars = jnp.stack([p["a1"], p["a2"]]).astype(jnp.float32)
    return slab, scalars


def discriminator_forward(x, params, *, block_b=32768):
    """x: (B, 1) float32. params: PyTorch-shaped weights/biases/PReLU alphas.

    block_b: batch-tile (lane) width, multiple of 128. At the default 32768 the
    per-step intermediates are only ~2 MiB each, comfortably inside the default
    scoped VMEM on v5e (16 MiB) and v6e/v7x (32 MiB).
    """
    B = x.shape[0]
    # Batch tile: multiple of 128 lanes, capped by block_b, and no larger than
    # half the batch (rounded up) so the "parallel" grid keeps >= 2 steps and
    # v7x can shard across its two TensorCores whenever B > 128.
    half = ((pl.cdiv(B, 2) + _LANE - 1) // _LANE) * _LANE
    tb = max(_LANE, min(block_b, half))
    grid = (pl.cdiv(B, tb),)

    # Metadata-only layout change: (B, 1) -> lane-dense (1, B). No padding
    # copy; Pallas handles the ragged last block (masked stores there only).
    xt = x.reshape(1, B)
    slab, scalars = _pack_params(params)

    out_t = pl.pallas_call(
        _discriminator_kernel,
        out_shape=jax.ShapeDtypeStruct((1, B), jnp.float32),
        grid=grid,
        in_specs=[
            pl.BlockSpec((1, tb), lambda i: (0, i)),      # x tile (batch on lanes)
            pl.BlockSpec((16, 16), lambda i: (0, 0)),     # packed params, resident
            pl.BlockSpec(memory_space=pltpu.SMEM),        # [alpha1, alpha2]
        ],
        out_specs=pl.BlockSpec((1, tb), lambda i: (0, i)),
        compiler_params=pltpu.CompilerParams(
            dimension_semantics=("parallel",),            # megacore-friendly
        ),
    )(xt, slab, scalars)

    # Restore the PyTorch (B, 1) output shape (metadata-only reshape).
    return out_t.reshape(B, 1)


def init_params(key):
    """Deterministic init matching torch.nn.Linear / PReLU shapes & ranges.
    Weights kept in PyTorch layout: (out_features, in_features)."""
    ks = jax.random.split(key, 3)

    def lin(k, fan_in, fan_out):
        bound = 1.0 / float(jnp.sqrt(jnp.float32(fan_in)))
        kw, kb = jax.random.split(k)
        w = jax.random.uniform(kw, (fan_out, fan_in), jnp.float32, -bound, bound)
        b = jax.random.uniform(kb, (fan_out,), jnp.float32, -bound, bound)
        return w, b

    w1, b1 = lin(ks[0], 1, 10)
    w2, b2 = lin(ks[1], 10, 10)
    w3, b3 = lin(ks[2], 10, 1)
    # torch.nn.PReLU default: single shared parameter initialized to 0.25
    return {"w1": w1, "b1": b1, "a1": jnp.float32(0.25),
            "w2": w2, "b2": b2, "a2": jnp.float32(0.25),
            "w3": w3, "b3": b3}


def reference_forward(x, p):
    """Pure-JAX reference in standard (B, features) layout, written fully
    elementwise (exact f32) so the comparison is precision-path independent."""
    prelu = lambda v, a: jnp.where(v >= 0.0, v, a * v)
    h1 = prelu(x * p["w1"].T + p["b1"], p["a1"])                      # (B, 10)
    h2 = prelu(jnp.sum(h1[:, None, :] * p["w2"][None, :, :], axis=-1)
               + p["b2"], p["a2"])                                    # (B, 10)
    h3 = jnp.sum(h2 * p["w3"], axis=-1, keepdims=True) + p["b3"]      # (B, 1)
    return jax.nn.sigmoid(h3)


if __name__ == "__main__":
    key = jax.random.PRNGKey(0)
    kx, kp = jax.random.split(key)

    B = 1000  # non-multiple of 128 to exercise the ragged last block
    x = jax.random.normal(kx, (B, 1), jnp.float32)
    params = init_params(kp)
    ref = reference_forward(x, params)

    # Small tile: multi-step grid + ragged last block.
    out_small = jax.block_until_ready(
        discriminator_forward(x, params, block_b=256))
    assert out_small.shape == (B, 1)
    assert jnp.allclose(out_small, ref, atol=1e-5, rtol=1e-5), "mismatch (small tile)"

    # Default (large-tile) path: tb capped to keep a >= 2-step parallel grid.
    out_big = jax.block_until_ready(discriminator_forward(x, params))
    assert out_big.shape == (B, 1)
    assert jnp.allclose(out_big, ref, atol=1e-5, rtol=1e-5), "mismatch (default tile)"

    print("KERNEL_OK")
</pallas_src>

<mosaic_0001>
module attributes {stable_mosaic.version = 11 : i64} {
  func.func @_discriminator_kernel(%arg0: i32, %arg1: memref<1x256xf32, #tpu.memory_space<vmem>>, %arg2: memref<16x16xf32, #tpu.memory_space<vmem>>, %arg3: memref<2xf32, #tpu.memory_space<smem>>, %arg4: memref<1x256xf32, #tpu.memory_space<vmem>>) attributes {dimension_semantics = [#tpu.dimension_semantics<parallel>], iteration_bounds = array<i64: 4>, scalar_prefetch = 0 : i64, scratch_operands = 0 : i64, tpu.core_type = #tpu.core_type<tc>, window_params = [{transform_indices = @transform_0, window_bounds = array<i64: 1, 256>}, {pipeline_mode = #tpu.pipeline_mode<synchronous>, transform_indices = @transform_1, window_bounds = array<i64: 16, 16>}, {transform_indices = @transform_2, window_bounds = array<i64: 2>}, {transform_indices = @transform_3, window_bounds = array<i64: 1, 256>}]} {
    %c0 = arith.constant 0 : index
    %c0_0 = arith.constant 0 : index
    %0 = vector.load %arg1[%c0, %c0_0] : memref<1x256xf32, #tpu.memory_space<vmem>>, vector<1x256xf32>
    %c0_1 = arith.constant 0 : index
    %1 = memref.load %arg3[%c0_1] : memref<2xf32, #tpu.memory_space<smem>>
    %c1 = arith.constant 1 : index
    %2 = memref.load %arg3[%c1] : memref<2xf32, #tpu.memory_space<smem>>
    %c0_2 = arith.constant 0 : index
    %c0_3 = arith.constant 0 : index
    %3 = vector.load %arg2[%c0_2, %c0_3] : memref<16x16xf32, #tpu.memory_space<vmem>>, vector<11x11xf32>
    %c0_4 = arith.constant 0 : index
    %c11 = arith.constant 11 : index
    %4 = vector.load %arg2[%c0_4, %c11] : memref<16x16xf32, #tpu.memory_space<vmem>>, vector<11x1xf32>
    %c0_5 = arith.constant 0 : index
    %c12 = arith.constant 12 : index
    %5 = vector.load %arg2[%c0_5, %c12] : memref<16x16xf32, #tpu.memory_space<vmem>>, vector<11x1xf32>
    %c12_6 = arith.constant 12 : index
    %c0_7 = arith.constant 0 : index
    %6 = vector.load %arg2[%c12_6, %c0_7] : memref<16x16xf32, #tpu.memory_space<vmem>>, vector<1x11xf32>
    %7 = vector.broadcast %4 : vector<11x1xf32> to vector<11x256xf32>
    %8 = vector.broadcast %0 : vector<1x256xf32> to vector<11x256xf32>
    %9 = arith.mulf %7, %8 : vector<11x256xf32>
    %10 = vector.broadcast %5 : vector<11x1xf32> to vector<11x256xf32>
    %11 = arith.addf %9, %10 : vector<11x256xf32>
    %cst = arith.constant 0.000000e+00 : f32
    %12 = vector.broadcast %cst : f32 to vector<11x256xf32>
    %13 = arith.cmpf oge, %11, %12 : vector<11x256xf32>
    %14 = vector.broadcast %1 : f32 to vector<11x256xf32>
    %15 = arith.mulf %14, %11 : vector<11x256xf32>
    %16 = arith.select %13, %11, %15 : vector<11x256xi1>, vector<11x256xf32>
    %cst_8 = arith.constant dense<0.000000e+00> : vector<11x256xf32>
    %17 = tpu.matmul %3, %16, %cst_8 {dimension_numbers = #tpu.dot_dimension_numbers<[1], [0], [0], [1], [0, 0, 1, 1], [], []>} : vector<11x11xf32>, vector<11x256xf32>, vector<11x256xf32> -> vector<11x256xf32>
    %cst_9 = arith.constant 0.000000e+00 : f32
    %18 = vector.broadcast %cst_9 : f32 to vector<11x256xf32>
    %19 = arith.cmpf oge, %17, %18 : vector<11x256xf32>
    %20 = vector.broadcast %2 : f32 to vector<11x256xf32>
    %21 = arith.mulf %20, %17 : vector<11x256xf32>
    %22 = arith.select %19, %17, %21 : vector<11x256xi1>, vector<11x256xf32>
    %cst_10 = arith.constant dense<0.000000e+00> : vector<1x256xf32>
    %23 = tpu.matmul %6, %22, %cst_10 {dimension_numbers = #tpu.dot_dimension_numbers<[1], [0], [0], [1], [0, 0, 1, 1], [], []>} : vector<1x11xf32>, vector<11x256xf32>, vector<1x256xf32> -> vector<1x256xf32>
    %24 = arith.negf %23 : vector<1x256xf32>
    %25 = math.exp %24 : vector<1x256xf32>
    %cst_11 = arith.constant 1.000000e+00 : f32
    %26 = vector.broadcast %cst_11 : f32 to vector<1x256xf32>
    %27 = arith.addf %26, %25 : vector<1x256xf32>
    %28 = arith.divf %26, %27 : vector<1x256xf32>
    %c0_12 = arith.constant 0 : index
    %c0_13 = arith.constant 0 : index
    %29 = vector.load %arg4[%c0_12, %c0_13] : memref<1x256xf32, #tpu.memory_space<vmem>>, vector<1x256xf32>
    tpu.vector_store %arg4[%c0_12, %c0_13], %28 {strides = array<i32>} : memref<1x256xf32, #tpu.memory_space<vmem>>, vector<1x256xf32>,
    return
  }
  func.func @transform_0(%arg0: i32) -> (i32, i32) {
    %c0_i32 = arith.constant 0 : i32
    %c0_i32_0 = arith.constant 0 : i32
    return %c0_i32, %arg0 : i32, i32
  }
  func.func @transform_1(%arg0: i32) -> (i32, i32) {
    %c0_i32 = arith.constant 0 : i32
    %c0_i32_0 = arith.constant 0 : i32
    %c0_i32_1 = arith.constant 0 : i32
    return %c0_i32, %c0_i32_0 : i32, i32
  }
  func.func @transform_2(%arg0: i32) -> i32 {
    %c0_i32 = arith.constant 0 : i32
    %c0_i32_0 = arith.constant 0 : i32
    return %c0_i32 : i32
  }
  func.func @transform_3(%arg0: i32) -> (i32, i32) {
    %c0_i32 = arith.constant 0 : i32
    %c0_i32_0 = arith.constant 0 : i32
    return %c0_i32, %arg0 : i32, i32
  }
}

</mosaic_0001>

<bundles_post_ra>
// kernel: tpu_custom_call.1
= control target key start
LH: loop header
LB: loop body
LE: loop exit
PB: predicated region body
PF: predicated region fallthrough
CT: control target
= control target key end

     0   :  { %8 = vsyncpa [#allocation3], 0  ;;  %s1143_s0 = inlined_call_operand.hbm [shape: f32[1,1000], index: 0, kind: input, shape index: {}]   ;;  %s1144_s1 = inlined_call_operand.hbm [shape: f32[16,16], index: 1, kind: input, shape index: {}]   ;;  %s1145_s2 = inlined_call_operand.vmem [shape: f32[2], index: 2, kind: input, shape index: {}]   ;;  %s1146_s3 = inlined_call_operand.hbm [shape: f32[1,1000], index: 3, kind: output, shape index: {}]  }
   0x1   :  { %10 = vsyncpa [#allocation3 + $0x1], 0 }
   0x2   :  { %11 = vsyncpa [#allocation7], 0 }
   0x3   :  { %12 = vsyncpa [#allocation5], 0 }
   0x4   :  { %13 = vsyncpa [#allocation4], 0 }
   0x5   :  { %15 = vsyncpa [#allocation4 + $0x1], 0  ;;  %s905_s12 = smov 0   ;;  %s907_s13 = smov 0  }
   0x6   :  { %s909_s14 = smov 0   ;;  %s911_s15 = smov 0  }
   0x7 LB: > { %s926_s16 = sadd.s32 4294967295, %s872_s15   ;;  %s598_s17 = sadd.s32 4294967294, %s872_s15   ;;  %s872_s15 = sphi %s911_s15, %s1169_s15   ;;  %s868_s14 = sphi %s909_s14, %s1168_s14   ;;  %s864_s13 = sphi %s907_s13, %s1167_s13   ;;  %s860_s12 = sphi %s905_s12, %s1166_s12  }
   0x8   : > { %p41_p0 = scmp.ne.s32.totalorder %s864_s13, %s860_s12  ;;  %p1147_p1 = scmp.eq.s32.totalorder %s926_s16, 0 }
   0x9   : > { %p113_p3 = scmp.eq.s32.totalorder %s598_s17, 3  ;;  %p599_p5 = scmp.ge.s32.totalorder %s872_s15, 1 }
   0xa   : > { %p935_p4 = por %p1147_p1, %p41_p0  ;;  %p120_p7 = scmp.lt.s32.totalorder %s872_s15, 5 }
   0xb   : > { %p940_p6 = por %p113_p3, %p41_p0  ;;  %s874_s21 = smov [#allocation6]  }
   0xc   : > { %s1150_s18 = scalar_select %p935_p4, 1, 0 }
   0xd   : > { %s1151_s19 = scalar_select %p940_p6, 1, 0 }
   0xe   : > { %p945_p8 = pnand %p599_p5, %p120_p7  ;;  %s132_s22 = sshll.u32 %s874_s21, 4  ;;  %s133_s22 = int_to_ptr.vmem [resolvable:$true] %s132_s22 }
   0xf   : > { %s146_s25 = sshll.u32 %s1145_s2, 4  ;;  %s725_s29 = scalar_lea.hbm %s1144_s1, 256  ;;  %s960_s25 = int_to_ptr.vmem [resolvable:$true] %s146_s25 }
  0x10   : > { %s1152_s20 = scalar_select %p945_p8, 1, 0 }
  0x11   : > { %p652_p9 = pneg %p945_p8  ;;  %p726_p11 = scmp.ne.s32.totalorder %s1144_s1, %s725_s29 }
  0x12   : > { %p732_p3 = scmp.lt.u32.totalorder %s725_s29, %s1144_s1 }
  0x13   : > { %p956_p10 = pnand %p652_p9, %p1147_p1 }
  0x15   : > { %p727_p12 = pneg %p956_p10 }
  0x17   : > { %p728_p13 = pnand %p727_p12, %p726_p11 }
  0x19   : > { %p729_p0 = pneg %p728_p13 }
  0x1b   : > { %p734_p5 = pnand %p732_p3, %p729_p0 }
  0x1d   : > { %737 = shalt.err (!%p734_p5)
}
  0x1e   : > { %s738_s7 = scalar_lea.vmem %s133_s22, 256  ;;  %p746_p2 = scmp.lt.s32.totalorder %s133_s22, %s133_s22 }
  0x1f   : > { %p739_p7 = scmp.ne.s32.totalorder %s133_s22, %s738_s7  ;;  %p747_p6 = scmp.lt.s32.totalorder %s738_s7, %s738_s7 }
  0x21   : > { %p741_p9 = pnand %p739_p7, %p727_p12  ;;  %p748_p4 = por %p747_p6, %p746_p2 }
  0x23   : > { %p742_p1 = pneg %p741_p9 }
  0x25   : > { %p749_p8 = pnand %p748_p4, %p742_p1 }
  0x27   : > { %752 = shalt.err (!%p749_p8)
}
  0x28   : > { %s875_s8 = smov 128   ;;  %s876_s9 = smov 8  }
  0x29   : > { %655 = dma.hbm_to_vmem [thread:$0]  (!%p956_p10), %s1144_s1, 256, %s133_s22, [#allocation7], %s875_s8, %s875_s8, %s876_s9  }
  0x2a   : > { %s753_s17 = scalar_lea.vmem %s960_s25, 16  ;;  %p761_p1 = scmp.lt.s32.totalorder %s960_s25, %s960_s25 }
  0x2b   : > { %p754_p11 = scmp.ne.s32.totalorder %s960_s25, %s753_s17  ;;  %p762_p4 = scmp.lt.s32.totalorder %s753_s17, %s753_s17 }
  0x2d   : > { %p756_p13 = pnand %p754_p11, %p727_p12  ;;  %p763_p6 = por %p762_p4, %p761_p1 }
  0x2f   : > { %p757_p2 = pneg %p756_p13 }
  0x31   : > { %p764_p8 = pnand %p763_p6, %p757_p2 }
  0x33   : > { %767 = shalt.err (!%p764_p8)
}
  0x34   : > { %s877_s21 = smov [#allocation8]   ;;  %s995_s22 = sadd.s32 1, %s872_s15  }
  0x35   : > { %658 = dma.vmem_to_smem (!%p956_p10), %s960_s25, 16, %s877_s21, [#allocation5]  }
  0x36   : > { %s28_s23 = sadd.s32 1, %s868_s14  ;;  %s25_s24 = ssub.s32 %s872_s15, %s995_s22 }
  0x37   : > { %p35_p12 = scmp.ne.s32.totalorder %s868_s14, %s864_s13  ;;  %p26_p0 = scmp.eq.s32.totalorder %s25_s24, 0 }
  0x38   : > { %p36_p3 = scmp.eq.s32.totalorder %s872_s15, 0  ;;  %p1154_p5 = scmp.eq.s32.totalorder %s926_s16, 3 }
  0x39   : > { %p669_p9 = scmp.lt.s32.totalorder %s872_s15, 4  ;;  %s157_s28 = sand.u32 1, %s868_s14  }
  0x3a   : > { %p1005_p7 = por %p1154_p5, %p35_p12  ;;  %p37_p11 = por %p36_p3, %p35_p12 }
  0x3b   : > { %s1011_s27 = scalar_select %p26_p0, %s868_s14, %s28_s23  }
  0x3c   : > { %s603_s29 = sshll.u32 %s157_s28, 1  ;;  %s626_s25 = sshll.u32 %s872_s15, 5 }
  0x3d   : > { %s1018_s5 = scalar_lea.hbm %s1143_s0, %s626_s25  ;;  %s161_s6 = scalar_lea.vmem [#allocation2], %s603_s29 }
  0x3e   : > { %s169_s7 = sshll.u32 %s161_s6, 4  ;;  %p1022_p10 = pnand %p669_p9, %p37_p11  ;;  %s1020_s7 = int_to_ptr.vmem [resolvable:$true] %s169_s7 }
  0x3f   : > { %s158_s9 = scalar_lea.sflag [#allocation3], %s157_s28  ;;  %s768_s10 = scalar_lea.hbm %s1018_s5, 32 }
  0x40   : > { %p769_p13 = scmp.ne.s32.totalorder %s1018_s5, %s768_s10  ;;  %p770_p2 = pneg %p1022_p10 }
  0x41   : > { %s773_s21 = scalar_lea.hbm %s1143_s0, 128  ;;  %p774_p6 = scmp.lt.u32.totalorder %s1018_s5, %s1143_s0 }
  0x42   : > { %p771_p1 = pnand %p770_p2, %p769_p13  ;;  %p775_p8 = scmp.lt.u32.totalorder %s773_s21, %s768_s10 }
  0x43   : > { %p777_p0 = scmp.lt.u32.totalorder %s768_s10, %s1018_s5 }
  0x44   : > { %p772_p4 = pneg %p771_p1  ;;  %p776_p12 = por %p775_p8, %p774_p6 }
  0x46   : > { %p778_p3 = por %p777_p0, %p776_p12 }
  0x48   : > { %p779_p5 = pnand %p778_p3, %p772_p4 }
  0x4a   : > { %782 = shalt.err (!%p779_p5)
}
  0x4b   : > { %s783_s28 = scalar_lea.vmem %s1020_s7, 32  ;;  %s878_s29 = smov [#allocation2]  }
  0x4c   : > { %p784_p9 = scmp.ne.s32.totalorder %s1020_s7, %s783_s28  ;;  %s788_s25 = sshll.u32 %s878_s29, 4  ;;  %s789_s25 = int_to_ptr.vmem [resolvable:$false] %s788_s25 }
  0x4d   : > { %s790_s30 = scalar_lea.vmem %s789_s25, 64  ;;  %p791_p1 = scmp.lt.s32.totalorder %s1020_s7, %s789_s25 }
  0x4e   : > { %p786_p11 = pnand %p784_p9, %p770_p2  ;;  %p792_p6 = scmp.lt.s32.totalorder %s790_s30, %s783_s28 }
  0x50   : > { %p787_p13 = pneg %p786_p11  ;;  %p793_p8 = por %p792_p6, %p791_p1 }
  0x52   : > { %p794_p12 = pnand %p793_p8, %p787_p13 }
  0x54   : > { %797 = shalt.err (!%p794_p12)
}
  0x55   : > { %662 = dma.hbm_to_vmem [thread:$0]  (!%p1022_p10), %s1018_s5, 32, %s1020_s7, %s158_s9  }
  0x56   : > { %p1157_p4 = scmp.ne.s32.totalorder %s1152_s20, 0 }
  0x57   : > { %s1054_s4 = sand.u32 (!%p1157_p4), 1, %s864_s13   ;;  %p1158_p2 = scmp.ne.s32.totalorder (!%p1157_p4), %s1150_s18, 0 }
  0x58   : > { %178 = sbr.rel (%p1157_p4) target bundleno = 737 (0x2e1), region = 32  ;;  %s607_s6 = sshll.u32 (!%p1157_p4), %s1054_s4, 1 }
  0x59   : > { %s181_s10 = scalar_lea.sflag (!%p1157_p4), [#allocation3], %s1054_s4  ;;  %s184_s11 = scalar_lea.vmem (!%p1157_p4), [#allocation2], %s607_s6 }
  0x5f   : > { %843 = dma.done.wait (%p1158_p2), %s181_s10, 32  }
  0x60   : > { %845 = vsyncadd (%p1158_p2), %s181_s10, 4294967264  ;;  %p1159_p10 = scmp.eq.s32.totalorder %s926_s16, 0 }
  0x62   : > { %847 = dma.done.wait (%p1159_p10), [#allocation7], 256   ;;  %p1160_p0 = pmov %p1159_p10 }
  0x64   : > { %849 = vsyncadd (%p1160_p0), [#allocation7], 4294967040  ;;  %p1161_p3 = pmov %p1160_p0 }
  0x65   : > { %p1162_p5 = pmov %p1160_p0 }
  0x66   : > { %851 = dma.done.wait (%p1161_p3), [#allocation5], 16  }
  0x67   : > { %853 = vsyncadd (%p1162_p5), [#allocation5], 4294967280 }
  0x68   : > { %197 = sfence }
  0x69   : > { %v221_v0 = vld [vmem:[#allocation6] sm:$0xff]  ;;  %v879_v1 = vmov 12   ;;  %v880_v2 = vmov 11   ;;  %v222_v3 = vld [vmem:[#allocation6 + $0x8] sm:$0x7]  ;;  %v881_v4 = vmov 0.0   ;;  %v235_v5 = vlaneseq }
  0x6a   : > { %715 = vset.pattern.permute.xlu1 %v879_v1  ;;  %714 = vset.pattern.permute.xlu0 %v880_v2  ;;  %v218_v9 = vld [vmem:[%s184_s11] sm:$0x3]  ;;  %s219_s18 = sld [smem:[#allocation8]]  ;;  %vm279_vm1 = vcmask 1042432   ;;  %vm882_vm5 = vmmov 1   ;;  %vm274_vm7 = vcmask 89088  }
  0x6b   : > { %250 = vperm.xlu1 %715, %v221_v0   ;;  %226 = vperm.xlu0 %714, %v221_v0   ;;  %v1073_v6 = vshrl.u32 %v235_v5, 7  ;;  %vm1077_vm6 = vmpackc.low %vm279_vm1, %vm882_vm5  ;;  %s611_s20 = sld [smem:[#allocation8 + $0x1]]  ;;  %v223_v51 = vld [vmem:[#allocation6 + $0xc] sm:$0x1]  ;;  %v883_v60 = vmov 1966171168  }
  0x6c   : > { %350 = vmatprep.mubr.f32.mxu0 %v881_v4  ;;  %449 = vmatprep.mubr.f32.mxu1 %v881_v4  ;;  %v472_v61 = vunpack.c.l.s4 %v883_v60  ;;  %s627_s5 = sshll.u32 %s926_s16, 5  ;;  %s215_s7 = scalar_lea.vmem [#allocation9], %s607_s6  ;;  %vm488_vm12 = vcmp.lt.s32.totalorder %v235_v5, 256 }
  0x6d   : > { %v237_v7 = vsub.s32 0, %v1073_v6  ;;  %v241_v8 = vsub.s32 1, %v1073_v6  ;;  %s506_s8 = sshll.u32 %s215_s7, 4  ;;  %s1100_s21 = scalar_lea.hbm %s1146_s3, %s627_s5  ;;  %s1102_s8 = int_to_ptr.vmem [resolvable:$true] %s506_s8 }
  0x6e   : > { %v473_v62 = vunpack.c.0.s8 %v472_v61  ;;  %s492_s23 = scalar_lea.sflag [#allocation4], %s1054_s4  ;;  %s798_s16 = scalar_lea.vmem %s1102_s8, 32 }
  0x6f   : > { %254 = vperm.xlu1 %715, %v222_v3   ;;  %231 = vperm.xlu0 %714, %v222_v3   ;;  %v238_v10 = vrot.slane %v218_v9, %v237_v7  ;;  %v242_v11 = vrot.slane %v218_v9, %v241_v8  ;;  %p799_p9 = scmp.ne.s32.totalorder %s1102_s8, %s798_s16  ;;  %s884_s24 = smov [#allocation9]  }
  0x70   : > { %v265_v18 = vstv %s219_s18  ;;  %s802_s28 = sshll.u32 %s884_s24, 4  ;;  %s803_s28 = int_to_ptr.vmem [resolvable:$false] %s802_s28 }
  0x71   : > { %v367_v37 = vstv %s611_s20  ;;  %p800_p11 = pnand %p799_p9, %p1005_p7  ;;  %s804_s29 = scalar_lea.vmem %s803_s28, 64 }
  0x72   : > { %p805_p1 = scmp.lt.s32.totalorder %s1102_s8, %s803_s28  ;;  %p806_p6 = scmp.lt.s32.totalorder %s804_s29, %s798_s16 }
  0x73   : > { %716 = vset.pattern.permute.xlu0 %v879_v1  ;;  %p801_p13 = pneg %p800_p11 }
  0x74   : > { %p807_p8 = por %p806_p6, %p805_p1 }
  0x76   : > { %p808_p12 = pnand %p807_p8, %p801_p13 }
  0xea   : > { %v251_v12 = vpop.permute.xlu1 %250  ;;  %v227_v13 = vpop.permute.xlu0 %226 }
  0xeb   : > { %v245_v14 = vmul.f32 %v238_v10, %v227_v13  ;;  %v246_v15 = vmul.f32 %v242_v11, %v227_v13 }
  0xed   : > { %v257_v16 = vadd.f32 %v251_v12, %v245_v14  ;;  %v258_v17 = vadd.f32 %v251_v12, %v246_v15 }
  0xee   : > { %v232_v19 = vpop.permute.xlu0 %231  ;;  %v255_v22 = vpop.permute.xlu1 %254 }
  0xef   : > { %v247_v20 = vmul.f32 %v238_v10, %v232_v19  ;;  %v248_v21 = vmul.f32 %v242_v11, %v232_v19  ;;  %v266_v23 = vmul.f32 %v265_v18, %v257_v16  ;;  %v267_v26 = vmul.f32 %v265_v18, %v258_v17 }
  0xf0   : > { %vm262_vm0 = vcmp.ge.f32.partialorder %v258_v17, 0.0  ;;  %vm261_vm2 = vcmp.ge.f32.partialorder %v257_v16, 0.0 }
  0xf1   : > { %v259_v24 = vadd.f32 %v255_v22, %v247_v20  ;;  %v260_v25 = vadd.f32 %v255_v22, %v248_v21  ;;  %v271_v29 = vsel %vm262_vm0, %v258_v17, %v267_v26  ;;  %v270_v32 = vsel %vm261_vm2, %v257_v16, %v266_v23 }
  0xf3   : > { %vm263_vm3 = vcmp.ge.f32.partialorder %v259_v24, 0.0  ;;  %v268_v27 = vmul.f32 %v265_v18, %v259_v24  ;;  %vm264_vm4 = vcmp.ge.f32.partialorder %v260_v25, 0.0  ;;  %v269_v28 = vmul.f32 %v265_v18, %v260_v25 }
  0xf5   : > { %v273_v30 = vsel %vm264_vm4, %v260_v25, %v269_v28  ;;  %v272_v33 = vsel %vm263_vm3, %v259_v24, %v268_v27 }
  0xf6   : > { %v628_v34 = vpack.c.bf16 %v273_v30, %v271_v29  ;;  %v631_v35 = vpack.c.bf16 %v272_v33, %v270_v32 }
  0xf8   : > { %630 = vmatprep.subr.msk.bf16.mxu0 %vm1077_vm6, %v628_v34 }
  0xf9   : > { %633 = vmatpush1.bf16.msk.msra.mxu0 %vm1077_vm6, %v631_v35 }
  0xfc   : > { %614 = vmatmul.mubr.msk.f32.vlgmr.msra.gmra.mrb[0].mxu0 %vm274_vm7, %v221_v0  ;;  %v476_v0 = vsub.s32 %v473_v62, %v1073_v6 }
  0xfd   : > { %356 = vmatprep.mubr.f32.mxu0 %v881_v4 }
 0x100   : > { %615 = vmatmul.mubr.msk.f32.gmra.mrb[2].mxu0 %vm274_vm7, %v222_v3 }
 0x1cf   : > { %v352_v36 = vpop.f32.mrb[0].mxu0 }
 0x1d0   : > { %v354_v38 = vpop.f32.mrb[1].mxu0  ;;  %v368_v39 = vmul.f32 %v367_v37, %v352_v36  ;;  %vm363_vm8 = vcmp.ge.f32.partialorder %v352_v36, 0.0 }
 0x1d1   : > { %v369_v40 = vmul.f32 %v367_v37, %v354_v38  ;;  %vm364_vm9 = vcmp.ge.f32.partialorder %v354_v38, 0.0 }
 0x1d2   : > { %v372_v45 = vsel %vm363_vm8, %v352_v36, %v368_v39 }
 0x1d3   : > { %v358_v41 = vpop.f32.mrb[2].mxu0  ;;  %v373_v48 = vsel %vm364_vm9, %v354_v38, %v369_v40 }
 0x1d4   : > { %vm365_vm10 = vcmp.ge.f32.partialorder %v358_v41, 0.0  ;;  %v370_v42 = vmul.f32 %v367_v37, %v358_v41  ;;  %v360_v43 = vpop.f32.mrb[3].mxu0 }
 0x1d5   : > { %vm366_vm11 = vcmp.ge.f32.partialorder %v360_v43, 0.0  ;;  %v371_v44 = vmul.f32 %v367_v37, %v360_v43 }
 0x1d6   : > { %v374_v46 = vsel %vm365_vm10, %v358_v41, %v370_v42 }
 0x1d7   : > { %v375_v47 = vsel %vm366_vm11, %v360_v43, %v371_v44  ;;  %v637_v49 = vpack.c.bf16 %v374_v46, %v372_v45 }
 0x1d8   : > { %v634_v50 = vpack.c.bf16 %v375_v47, %v373_v48 }
 0x1da   : > { %636 = vmatprep.subr.msk.bf16.mxu1 %vm1077_vm6, %v634_v50 }
 0x1db   : > { %639 = vmatpush1.bf16.msk.msra.mxu1 %vm1077_vm6, %v637_v49 }
 0x1de   : > { %618 = vmatmul.mubr.msk.f32.vlgmr.msra.gmra.mrb[0].mxu1 %vm274_vm7, %v223_v51 }
 0x2b1   : > { %v451_v52 = vpop.f32.mrb[0].mxu1 }
 0x2b2   : > { %v619_v53 = vmul.f32 -1.442695, %v451_v52  ;;  %v453_v54 = vpop.f32.mrb[1].mxu1 }
 0x2b3   : > { %v620_v55 = vmul.f32 -1.442695, %v453_v54 }
 0x2b4   : > { %717 = vpow2.f32 %v619_v53 }
 0x2b5   : > { %719 = vpow2.f32 %v620_v55 }
 0x2be   : > { %v718_v56 = vpop.eup %717 }
 0x2bf   : > { %v720_v57 = vpop.eup %719  ;;  %v462_v58 = vadd.f32 1.0, %v718_v56 }
 0x2c0   : > { %v463_v59 = vadd.f32 1.0, %v720_v57 }
 0x2c1   : > { %721 = vrcp.f32 %v462_v58 }
 0x2c2   : > { %723 = vrcp.f32 %v463_v59 }
 0x2cb   : > { %v722_v63 = vpop.eup %721 }
 0x2cc   : > { %v724_v1 = vpop.eup %723 }
 0x2cd   : > { %v470_v2 = vcombine.low %v722_v63, %v724_v1 }
 0x2cf   : > { %v477_v3 = vrot.slane %v470_v2, %v476_v0 }
 0x2d1   : > { %v484_v4 = vrot.slane %v477_v3, %v476_v0 }
 0x2d3   : > { %490 = vst.msk [vmem:[%s215_s7] sm:$0x3] %vm488_vm12, %v484_v4 }
 0x2d4   : > { %811 = shalt.err (!%p808_p12)
}
 0x2d5   : > { %s812_s25 = scalar_lea.hbm %s1100_s21, 32  ;;  %s816_s6 = scalar_lea.hbm %s1146_s3, 128 }
 0x2d6   : > { %p813_p4 = scmp.ne.s32.totalorder %s1100_s21, %s812_s25  ;;  %p817_p0 = scmp.lt.u32.totalorder %s1100_s21, %s1146_s3 }
 0x2d7   : > { %p818_p3 = scmp.lt.u32.totalorder %s816_s6, %s812_s25  ;;  %p820_p9 = scmp.lt.u32.totalorder %s812_s25, %s1100_s21 }
 0x2d8   : > { %p814_p2 = pnand %p813_p4, %p1005_p7 }
 0x2d9   : > { %p819_p5 = por %p818_p3, %p817_p0 }
 0x2da   : > { %p815_p10 = pneg %p814_p2 }
 0x2db   : > { %p821_p11 = por %p820_p9, %p819_p5 }
 0x2dd   : > { %p822_p13 = pnand %p821_p11, %p815_p10 }
 0x2df   : > { %825 = shalt.err (!%p822_p13)
}
 0x2e0   : > { %650 = dma.vmem_to_hbm [thread:$0]  (%p1005_p7), %s1102_s8, 32, %s1100_s21, %s492_s23  }
 0x2e1 PF: > { %p672_p1 = scmp.ge.s32.totalorder %s872_s15, 2  ;;  %s518_s18 = sand.u32 1, %s860_s12  }
 0x2e2   : > { %p1165_p6 = scmp.ne.s32.totalorder %s1151_s19, 0  ;;  %s519_s20 = scalar_lea.sflag [#allocation4], %s518_s18 }
 0x2e4   : > { %p664_p8 = pnand %p672_p1, %p1165_p6 }
 0x2e6   : > { %855 = dma.done.wait (!%p664_p8), %s519_s20, 32  }
 0x2e7   : > { %857 = vsyncadd (!%p664_p8), %s519_s20, 4294967264  ;;  %p18_p12 = scmp.ge.s32.totalorder %s995_s22, 6   ;;  %s1166_s12 = smov %s864_s13 }
 0x2e8   : > { %s1167_s13 = smov %s868_s14  ;;  %s1168_s14 = smov %s1011_s27 }
 0x2e9   : > { %s1169_s15 = smov %s995_s22  ;;  %20 = sbr.rel (!%p18_p12) target bundleno = 7 (0x7), region = 86 }
 0x2f0   :  { %524 = vsyncpa [#allocation3], 1 }
 0x2f1   :  { %526 = vsyncpa [#allocation3 + $0x1], 1 }
 0x2f2   :  { %527 = vsyncpa [#allocation7], 1 }
 0x2f3   :  { %528 = vsyncpa [#allocation4], 1 }
 0x2f4   :  { %530 = vsyncpa [#allocation4 + $0x1], 1 }
 0x2f5   :  { %531 = vsyncpa [#allocation5], 1 }
 0x2f6   :  { %533 = vsyncpa [#allocation5 + $0x1], 1 }

</bundles_post_ra>
